<compile_context>
chip_gen: v5e
topology: v5e:2x2
jax: 0.10.0
libtpu: 0.0.40
codegen_flags: <defaults>
</compile_context>

<pallas_src>
import jax
import jax.numpy as jnp
from jax import lax
from jax.experimental import pallas as pl
from jax.experimental.pallas import tpu as pltpu


# ----------------------------------------------------------------------------
# Trace-time helpers (interpolation matrix, pad folding, boundary masks)
# ----------------------------------------------------------------------------
def _interp_matrix(out_size, in_size):
    """Bilinear interpolation matrix, align_corners=True (PyTorch Upsample)."""
    if in_size == 1:
        return jnp.ones((out_size, 1), jnp.float32)
    src = jnp.arange(out_size, dtype=jnp.float32) * (in_size - 1) / (out_size - 1)
    lo = jnp.clip(jnp.floor(src).astype(jnp.int32), 0, in_size - 2)
    frac = src - lo.astype(jnp.float32)
    return (jax.nn.one_hot(lo, in_size, dtype=jnp.float32) * (1.0 - frac)[:, None]
            + jax.nn.one_hot(lo + 1, in_size, dtype=jnp.float32) * frac[:, None])


def _up_pad_matrix(H1, W1, H2, W2):
    """(H1*W1, H2*W2) matrix: flattened x1 @ M == flattened(pad(upsample2x(x1)))."""
    Mh = _interp_matrix(2 * H1, H1)                      # (2H1, H1)
    Mw = _interp_matrix(2 * W1, W1)                      # (2W1, W1)
    dY, dX = H2 - 2 * H1, W2 - 2 * W1                    # F.pad amounts (static)
    Ah = jnp.zeros((H2, H1), jnp.float32).at[dY // 2:dY // 2 + 2 * H1, :].set(Mh)
    Aw = jnp.zeros((W2, W1), jnp.float32).at[dX // 2:dX // 2 + 2 * W1, :].set(Mw)
    return jnp.kron(Ah, Aw).T                            # (H1*W1, H2*W2)


def _tap_masks(H, W):
    """(9, H*W) validity mask per 3x3 tap (zero where the tap reads padding)."""
    y = jnp.repeat(jnp.arange(H), W)
    x = jnp.tile(jnp.arange(W), H)
    ms = []
    for dy in range(3):
        for dx in range(3):
            ok = ((y + dy - 1 >= 0) & (y + dy - 1 < H) &
                  (x + dx - 1 >= 0) & (x + dx - 1 < W))
            ms.append(ok.astype(jnp.float32))
    return jnp.stack(ms, axis=0)


# ----------------------------------------------------------------------------
# Fused Pallas kernel: upsample+pad+concat + conv1+BN+ReLU + conv2+BN+ReLU
# ----------------------------------------------------------------------------
def _make_up_kernel(W, OFF):
    def kernel(x1_ref, x2_ref, kron_ref, mask_ref,
               w1_ref, b1_ref, w2_ref, b2_ref,
               o_ref, line_ref, patch_ref):
        # x1_ref : (1, C1, H1*W1)   deep feature, flattened spatial
        # x2_ref : (1, C2, HW)      skip connection, flattened spatial
        # kron   : (H1*W1, HW)      fused upsample+pad matrix
        # mask   : (9, HW)          per-tap boundary masks
        # w1     : (Cmid, 9*Cin)    conv1 weights, BN scale folded in
        # b1     : (Cmid, 1)        folded BN bias
        # w2     : (Cout, 9*Cmid)   conv2 weights, BN scale folded in
        # b2     : (Cout, 1)
        # o_ref  : (1, Cout, HW)    lane-dense output
        # line_ref : VMEM (Cmax, OFF + HW + W + 1)  zero-padded flattened rows
        # patch_ref: VMEM (9*Cmax, HW)              im2col patch matrix
        HW = x2_ref.shape[2]
        c1 = x1_ref.shape[1]
        c2 = x2_ref.shape[1]
        cin = w1_ref.shape[1] // 9
        cmid = w1_ref.shape[0]
        masks = mask_ref[...]                                    # (9, HW)

        # --- Stage 1: bilinear up2x + pad (one matmul) + channel concat ----
        line_ref[...] = jnp.zeros(line_ref.shape, line_ref.dtype)
        line_ref[0:c2, OFF:OFF + HW] = x2_ref[0].astype(jnp.float32)
        up = jnp.dot(x1_ref[0].astype(jnp.float32), kron_ref[...],
                     preferred_element_type=jnp.float32)         # (C1, HW)
        line_ref[c2:c2 + c1, OFF:OFF + HW] = up

        def im2col(c):
            # Build (9*c, HW) patch matrix from line_ref[0:c] via 9 shifted,
            # masked lane windows (static offsets, no per-tap matmuls).
            for dy in range(3):
                for dx in range(3):
                    t = dy * 3 + dx
                    s = (dy - 1) * W + (dx - 1)
                    win = line_ref[0:c, OFF + s:OFF + s + HW]    # (c, HW)
                    patch_ref[t * c:(t + 1) * c, :] = win * masks[t:t + 1, :]

        # --- Stage 2: conv1 (single MXU matmul, K=9*Cin) + BN bias + ReLU --
        im2col(cin)
        h = jnp.dot(w1_ref[...], patch_ref[0:9 * cin, :],
                    preferred_element_type=jnp.float32) + b1_ref[...]
        h = jnp.maximum(h, 0.0)                                  # (Cmid, HW)

        # --- Stage 3: conv2 (single MXU matmul, K=9*Cmid) + BN bias + ReLU -
        line_ref[0:cmid, OFF:OFF + HW] = h                       # pad cols stay 0
        im2col(cmid)
        y = jnp.dot(w2_ref[...], patch_ref[0:9 * cmid, :],
                    preferred_element_type=jnp.float32) + b2_ref[...]
        o_ref[0] = jnp.maximum(y, 0.0).astype(o_ref.dtype)

    return kernel


# ----------------------------------------------------------------------------
# Wrapper: fold BN into weights, precompute matrices, single pallas_call
# ----------------------------------------------------------------------------
@jax.jit
def up_forward(params, x1_nchw, x2_nchw):
    B, C1, H1, W1 = x1_nchw.shape
    _, C2, H2, W2 = x2_nchw.shape
    HW = H2 * W2

    w1, s1, b1 = params['w1'], params['s1'], params['b1']
    w2, s2, b2 = params['w2'], params['s2'], params['b2']
    Cin, Cmid = w1.shape[2], w1.shape[3]
    Cout = w2.shape[3]

    kronT = _up_pad_matrix(H1, W1, H2, W2)                   # (H1*W1, HW)
    masks = _tap_masks(H2, W2)                               # (9, HW)
    # Fold BN scale into conv weights; flatten taps: row = (dy*3+dx)*Cin + c.
    wf1 = w1.reshape(9 * Cin, Cmid).T * s1[:, None]          # (Cmid, 9*Cin)
    wf2 = w2.reshape(9 * Cmid, Cout).T * s2[:, None]         # (Cout, 9*Cmid)
    bc1 = b1.reshape(Cmid, 1)
    bc2 = b2.reshape(Cout, 1)

    x1f = x1_nchw.reshape(B, C1, H1 * W1).astype(jnp.float32)
    x2f = x2_nchw.reshape(B, C2, HW).astype(jnp.float32)

    cmax = max(Cin, Cmid)
    OFF = ((W2 + 1 + 127) // 128) * 128       # lane-aligned store offset
    line_w = OFF + HW + W2 + 1

    out = pl.pallas_call(
        _make_up_kernel(W2, OFF),
        out_shape=jax.ShapeDtypeStruct((B, Cout, HW), jnp.float32),
        grid=(B,),
        in_specs=[
            pl.BlockSpec((1, C1, H1 * W1), lambda b: (b, 0, 0)),
            pl.BlockSpec((1, C2, HW), lambda b: (b, 0, 0)),
            pl.BlockSpec((H1 * W1, HW), lambda b: (0, 0)),
            pl.BlockSpec((9, HW), lambda b: (0, 0)),
            pl.BlockSpec((Cmid, 9 * Cin), lambda b: (0, 0)),
            pl.BlockSpec((Cmid, 1), lambda b: (0, 0)),
            pl.BlockSpec((Cout, 9 * Cmid), lambda b: (0, 0)),
            pl.BlockSpec((Cout, 1), lambda b: (0, 0)),
        ],
        out_specs=pl.BlockSpec((1, Cout, HW), lambda b: (b, 0, 0)),
        scratch_shapes=[
            pltpu.VMEM((cmax, line_w), jnp.float32),
            pltpu.VMEM((9 * cmax, HW), jnp.float32),
        ],
        compiler_params=pltpu.CompilerParams(
            dimension_semantics=("parallel",)),
    )(x1f, x2f, kronT, masks, wf1, bc1, wf2, bc2)

    return out.reshape(B, Cout, H2, W2)


# ----------------------------------------------------------------------------
# Deterministic synthetic parameters (BN in eval mode, folded to scale/bias)
# ----------------------------------------------------------------------------
def init_up_params(key, in_channels, out_channels):
    mid = in_channels // 2
    eps = 1e-5
    ks = jax.random.split(key, 10)

    def bn(kg, kb, km, kv, c):
        gamma = jax.random.uniform(kg, (c,), jnp.float32, 0.5, 1.5)
        beta = 0.1 * jax.random.normal(kb, (c,), jnp.float32)
        mean = 0.1 * jax.random.normal(km, (c,), jnp.float32)
        var = jax.random.uniform(kv, (c,), jnp.float32, 0.5, 1.5)
        scale = gamma / jnp.sqrt(var + eps)
        bias = beta - mean * scale
        return scale, bias

    w1 = 0.1 * jax.random.normal(ks[0], (3, 3, in_channels, mid), jnp.float32)
    s1, b1 = bn(ks[1], ks[2], ks[3], ks[4], mid)
    w2 = 0.1 * jax.random.normal(ks[5], (3, 3, mid, out_channels), jnp.float32)
    s2, b2 = bn(ks[6], ks[7], ks[8], ks[9], out_channels)
    return dict(w1=w1, s1=s1, b1=b1, w2=w2, s2=s2, b2=b2)


# ----------------------------------------------------------------------------
# Pure-JAX reference (same eval-mode semantics) for correctness checking
# ----------------------------------------------------------------------------
def up_reference(params, x1_nchw, x2_nchw):
    B, C1, H1, W1 = x1_nchw.shape
    H2, W2 = x2_nchw.shape[2], x2_nchw.shape[3]
    Mh = _interp_matrix(2 * H1, H1)
    Mw = _interp_matrix(2 * W1, W1)
    up = jnp.einsum('oh,bchw->bcow', Mh, x1_nchw, precision=lax.Precision.HIGHEST)
    up = jnp.einsum('pw,bcow->bcop', Mw, up, precision=lax.Precision.HIGHEST)
    dY, dX = H2 - up.shape[2], W2 - up.shape[3]
    up = jnp.pad(up, ((0, 0), (0, 0),
                      (dY // 2, dY - dY // 2), (dX // 2, dX - dX // 2)))
    x = jnp.concatenate([x2_nchw, up], axis=1)

    def conv_bn_relu(x, w, s, b):
        y = lax.conv_general_dilated(
            x, w, window_strides=(1, 1), padding='SAME',
            dimension_numbers=('NCHW', 'HWIO', 'NCHW'),
            precision=lax.Precision.HIGHEST)
        y = y * s[None, :, None, None] + b[None, :, None, None]
        return jnp.maximum(y, 0.0)

    y = conv_bn_relu(x, params['w1'], params['s1'], params['b1'])
    return conv_bn_relu(y, params['w2'], params['s2'], params['b2'])


if __name__ == "__main__":
    key = jax.random.PRNGKey(0)
    k1, k2, kp = jax.random.split(key, 3)

    in_channels, out_channels = 8, 4        # Up(8, 4, bilinear=True)
    B = 2
    # x1: deep feature (B, in/2, 8, 8); x2: skip connection (B, in/2, 16, 16)
    x1 = jax.random.normal(k1, (B, in_channels // 2, 8, 8), jnp.float32)
    x2 = jax.random.normal(k2, (B, in_channels // 2, 16, 16), jnp.float32)
    params = init_up_params(kp, in_channels, out_channels)

    out = jax.block_until_ready(up_forward(params, x1, x2))
    assert out.shape == (B, out_channels, 16, 16), out.shape
    assert bool(jnp.all(jnp.isfinite(out)))

    ref = jax.block_until_ready(up_reference(params, x1, x2))
    max_err = float(jnp.max(jnp.abs(out - ref)))
    assert bool(jnp.allclose(out, ref, atol=2e-3, rtol=2e-3)), max_err

    print("KERNEL_OK")
</pallas_src>

<mosaic_0001>
module attributes {stable_mosaic.version = 11 : i64} {
  func.func @kernel(%arg0: i32, %arg1: memref<1x4x64xf32, #tpu.memory_space<vmem>>, %arg2: memref<1x4x256xf32, #tpu.memory_space<vmem>>, %arg3: memref<64x256xf32, #tpu.memory_space<vmem>>, %arg4: memref<9x256xf32, #tpu.memory_space<vmem>>, %arg5: memref<4x72xf32, #tpu.memory_space<vmem>>, %arg6: memref<4x1xf32, #tpu.memory_space<vmem>>, %arg7: memref<4x36xf32, #tpu.memory_space<vmem>>, %arg8: memref<4x1xf32, #tpu.memory_space<vmem>>, %arg9: memref<1x4x256xf32, #tpu.memory_space<vmem>>, %arg10: memref<8x401xf32, #tpu.memory_space<vmem>>, %arg11: memref<72x256xf32, #tpu.memory_space<vmem>>) attributes {dimension_semantics = [#tpu.dimension_semantics<parallel>], iteration_bounds = array<i64: 2>, scalar_prefetch = 0 : i64, scratch_operands = 2 : i64, tpu.core_type = #tpu.core_type<tc>, window_params = [{transform_indices = @transform_0, window_bounds = array<i64: 1, 4, 64>}, {transform_indices = @transform_1, window_bounds = array<i64: 1, 4, 256>}, {pipeline_mode = #tpu.pipeline_mode<synchronous>, transform_indices = @transform_2, window_bounds = array<i64: 64, 256>}, {pipeline_mode = #tpu.pipeline_mode<synchronous>, transform_indices = @transform_3, window_bounds = array<i64: 9, 256>}, {pipeline_mode = #tpu.pipeline_mode<synchronous>, transform_indices = @transform_4, window_bounds = array<i64: 4, 72>}, {pipeline_mode = #tpu.pipeline_mode<synchronous>, transform_indices = @transform_5, window_bounds = array<i64: 4, 1>}, {pipeline_mode = #tpu.pipeline_mode<synchronous>, transform_indices = @transform_6, window_bounds = array<i64: 4, 36>}, {pipeline_mode = #tpu.pipeline_mode<synchronous>, transform_indices = @transform_7, window_bounds = array<i64: 4, 1>}, {transform_indices = @transform_8, window_bounds = array<i64: 1, 4, 256>}]} {
    %c0 = arith.constant 0 : index
    %c0_0 = arith.constant 0 : index
    %0 = vector.load %arg4[%c0, %c0_0] : memref<9x256xf32, #tpu.memory_space<vmem>>, vector<9x256xf32>
    %cst = arith.constant 0.000000e+00 : f32
    %1 = vector.broadcast %cst : f32 to vector<8x401xf32>
    %c0_1 = arith.constant 0 : index
    %c0_2 = arith.constant 0 : index
    %2 = vector.load %arg10[%c0_1, %c0_2] : memref<8x401xf32, #tpu.memory_space<vmem>>, vector<8x401xf32>
    tpu.vector_store %arg10[%c0_1, %c0_2], %1 {strides = array<i32>} : memref<8x401xf32, #tpu.memory_space<vmem>>, vector<8x401xf32>,
    %c0_3 = arith.constant 0 : index
    %c0_4 = arith.constant 0 : index
    %c0_5 = arith.constant 0 : index
    %3 = vector.load %arg2[%c0_3, %c0_4, %c0_5] : memref<1x4x256xf32, #tpu.memory_space<vmem>>, vector<1x4x256xf32>
    %4 = vector.shape_cast %3 : vector<1x4x256xf32> to vector<4x256xf32>
    %c0_6 = arith.constant 0 : index
    %c128 = arith.constant 128 : index
    %5 = vector.load %arg10[%c0_6, %c128] : memref<8x401xf32, #tpu.memory_space<vmem>>, vector<4x256xf32>
    tpu.vector_store %arg10[%c0_6, %c128], %4 {strides = array<i32>} : memref<8x401xf32, #tpu.memory_space<vmem>>, vector<4x256xf32>,
    %c0_7 = arith.constant 0 : index
    %c0_8 = arith.constant 0 : index
    %c0_9 = arith.constant 0 : index
    %6 = vector.load %arg1[%c0_7, %c0_8, %c0_9] : memref<1x4x64xf32, #tpu.memory_space<vmem>>, vector<1x4x64xf32>
    %7 = vector.shape_cast %6 : vector<1x4x64xf32> to vector<4x64xf32>
    %c0_10 = arith.constant 0 : index
    %c0_11 = arith.constant 0 : index
    %8 = vector.load %arg3[%c0_10, %c0_11] : memref<64x256xf32, #tpu.memory_space<vmem>>, vector<64x256xf32>
    %cst_12 = arith.constant dense<0.000000e+00> : vector<4x256xf32>
    %9 = tpu.matmul %7, %8, %cst_12 {dimension_numbers = #tpu.dot_dimension_numbers<[1], [0], [0], [1], [0, 0, 1, 1], [], []>} : vector<4x64xf32>, vector<64x256xf32>, vector<4x256xf32> -> vector<4x256xf32>
    %c4 = arith.constant 4 : index
    %c128_13 = arith.constant 128 : index
    %10 = vector.load %arg10[%c4, %c128_13] : memref<8x401xf32, #tpu.memory_space<vmem>>, vector<4x256xf32>
    tpu.vector_store %arg10[%c4, %c128_13], %9 {strides = array<i32>} : memref<8x401xf32, #tpu.memory_space<vmem>>, vector<4x256xf32>,
    %c0_14 = arith.constant 0 : index
    %c111 = arith.constant 111 : index
    %11 = vector.load %arg10[%c0_14, %c111] : memref<8x401xf32, #tpu.memory_space<vmem>>, vector<8x256xf32>
    %12 = vector.extract_strided_slice %0 {offsets = [0, 0], sizes = [1, 256], strides = [1, 1]} : vector<9x256xf32> to vector<1x256xf32>
    %13 = vector.broadcast %12 : vector<1x256xf32> to vector<8x256xf32>
    %14 = arith.mulf %11, %13 : vector<8x256xf32>
    %c0_15 = arith.constant 0 : index
    %c0_16 = arith.constant 0 : index
    %15 = vector.load %arg11[%c0_15, %c0_16] : memref<72x256xf32, #tpu.memory_space<vmem>>, vector<8x256xf32>
    tpu.vector_store %arg11[%c0_15, %c0_16], %14 {strides = array<i32>} : memref<72x256xf32, #tpu.memory_space<vmem>>, vector<8x256xf32>,
    %c0_17 = arith.constant 0 : index
    %c112 = arith.constant 112 : index
    %16 = vector.load %arg10[%c0_17, %c112] : memref<8x401xf32, #tpu.memory_space<vmem>>, vector<8x256xf32>
    %17 = vector.extract_strided_slice %0 {offsets = [1, 0], sizes = [1, 256], strides = [1, 1]} : vector<9x256xf32> to vector<1x256xf32>
    %18 = vector.broadcast %17 : vector<1x256xf32> to vector<8x256xf32>
    %19 = arith.mulf %16, %18 : vector<8x256xf32>
    %c8 = arith.constant 8 : index
    %c0_18 = arith.constant 0 : index
    %20 = vector.load %arg11[%c8, %c0_18] : memref<72x256xf32, #tpu.memory_space<vmem>>, vector<8x256xf32>
    tpu.vector_store %arg11[%c8, %c0_18], %19 {strides = array<i32>} : memref<72x256xf32, #tpu.memory_space<vmem>>, vector<8x256xf32>,
    %c0_19 = arith.constant 0 : index
    %c113 = arith.constant 113 : index
    %21 = vector.load %arg10[%c0_19, %c113] : memref<8x401xf32, #tpu.memory_space<vmem>>, vector<8x256xf32>
    %22 = vector.extract_strided_slice %0 {offsets = [2, 0], sizes = [1, 256], strides = [1, 1]} : vector<9x256xf32> to vector<1x256xf32>
    %23 = vector.broadcast %22 : vector<1x256xf32> to vector<8x256xf32>
    %24 = arith.mulf %21, %23 : vector<8x256xf32>
    %c16 = arith.constant 16 : index
    %c0_20 = arith.constant 0 : index
    %25 = vector.load %arg11[%c16, %c0_20] : memref<72x256xf32, #tpu.memory_space<vmem>>, vector<8x256xf32>
    tpu.vector_store %arg11[%c16, %c0_20], %24 {strides = array<i32>} : memref<72x256xf32, #tpu.memory_space<vmem>>, vector<8x256xf32>,
    %c0_21 = arith.constant 0 : index
    %c127 = arith.constant 127 : index
    %26 = vector.load %arg10[%c0_21, %c127] : memref<8x401xf32, #tpu.memory_space<vmem>>, vector<8x256xf32>
    %27 = vector.extract_strided_slice %0 {offsets = [3, 0], sizes = [1, 256], strides = [1, 1]} : vector<9x256xf32> to vector<1x256xf32>
    %28 = vector.broadcast %27 : vector<1x256xf32> to vector<8x256xf32>
    %29 = arith.mulf %26, %28 : vector<8x256xf32>
    %c24 = arith.constant 24 : index
    %c0_22 = arith.constant 0 : index
    %30 = vector.load %arg11[%c24, %c0_22] : memref<72x256xf32, #tpu.memory_space<vmem>>, vector<8x256xf32>
    tpu.vector_store %arg11[%c24, %c0_22], %29 {strides = array<i32>} : memref<72x256xf32, #tpu.memory_space<vmem>>, vector<8x256xf32>,
    %c0_23 = arith.constant 0 : index
    %c128_24 = arith.constant 128 : index
    %31 = vector.load %arg10[%c0_23, %c128_24] : memref<8x401xf32, #tpu.memory_space<vmem>>, vector<8x256xf32>
    %32 = vector.extract_strided_slice %0 {offsets = [4, 0], sizes = [1, 256], strides = [1, 1]} : vector<9x256xf32> to vector<1x256xf32>
    %33 = vector.broadcast %32 : vector<1x256xf32> to vector<8x256xf32>
    %34 = arith.mulf %31, %33 : vector<8x256xf32>
    %c32 = arith.constant 32 : index
    %c0_25 = arith.constant 0 : index
    %35 = vector.load %arg11[%c32, %c0_25] : memref<72x256xf32, #tpu.memory_space<vmem>>, vector<8x256xf32>
    tpu.vector_store %arg11[%c32, %c0_25], %34 {strides = array<i32>} : memref<72x256xf32, #tpu.memory_space<vmem>>, vector<8x256xf32>,
    %c0_26 = arith.constant 0 : index
    %c129 = arith.constant 129 : index
    %36 = vector.load %arg10[%c0_26, %c129] : memref<8x401xf32, #tpu.memory_space<vmem>>, vector<8x256xf32>
    %37 = vector.extract_strided_slice %0 {offsets = [5, 0], sizes = [1, 256], strides = [1, 1]} : vector<9x256xf32> to vector<1x256xf32>
    %38 = vector.broadcast %37 : vector<1x256xf32> to vector<8x256xf32>
    %39 = arith.mulf %36, %38 : vector<8x256xf32>
    %c40 = arith.constant 40 : index
    %c0_27 = arith.constant 0 : index
    %40 = vector.load %arg11[%c40, %c0_27] : memref<72x256xf32, #tpu.memory_space<vmem>>, vector<8x256xf32>
    tpu.vector_store %arg11[%c40, %c0_27], %39 {strides = array<i32>} : memref<72x256xf32, #tpu.memory_space<vmem>>, vector<8x256xf32>,
    %c0_28 = arith.constant 0 : index
    %c143 = arith.constant 143 : index
    %41 = vector.load %arg10[%c0_28, %c143] : memref<8x401xf32, #tpu.memory_space<vmem>>, vector<8x256xf32>
    %42 = vector.extract_strided_slice %0 {offsets = [6, 0], sizes = [1, 256], strides = [1, 1]} : vector<9x256xf32> to vector<1x256xf32>
    %43 = vector.broadcast %42 : vector<1x256xf32> to vector<8x256xf32>
    %44 = arith.mulf %41, %43 : vector<8x256xf32>
    %c48 = arith.constant 48 : index
    %c0_29 = arith.constant 0 : index
    %45 = vector.load %arg11[%c48, %c0_29] : memref<72x256xf32, #tpu.memory_space<vmem>>, vector<8x256xf32>
    tpu.vector_store %arg11[%c48, %c0_29], %44 {strides = array<i32>} : memref<72x256xf32, #tpu.memory_space<vmem>>, vector<8x256xf32>,
    %c0_30 = arith.constant 0 : index
    %c144 = arith.constant 144 : index
    %46 = vector.load %arg10[%c0_30, %c144] : memref<8x401xf32, #tpu.memory_space<vmem>>, vector<8x256xf32>
    %47 = vector.extract_strided_slice %0 {offsets = [7, 0], sizes = [1, 256], strides = [1, 1]} : vector<9x256xf32> to vector<1x256xf32>
    %48 = vector.broadcast %47 : vector<1x256xf32> to vector<8x256xf32>
    %49 = arith.mulf %46, %48 : vector<8x256xf32>
    %c56 = arith.constant 56 : index
    %c0_31 = arith.constant 0 : index
    %50 = vector.load %arg11[%c56, %c0_31] : memref<72x256xf32, #tpu.memory_space<vmem>>, vector<8x256xf32>
    tpu.vector_store %arg11[%c56, %c0_31], %49 {strides = array<i32>} : memref<72x256xf32, #tpu.memory_space<vmem>>, vector<8x256xf32>,
    %c0_32 = arith.constant 0 : index
    %c145 = arith.constant 145 : index
    %51 = vector.load %arg10[%c0_32, %c145] : memref<8x401xf32, #tpu.memory_space<vmem>>, vector<8x256xf32>
    %52 = vector.extract_strided_slice %0 {offsets = [8, 0], sizes = [1, 256], strides = [1, 1]} : vector<9x256xf32> to vector<1x256xf32>
    %53 = vector.broadcast %52 : vector<1x256xf32> to vector<8x256xf32>
    %54 = arith.mulf %51, %53 : vector<8x256xf32>
    %c64 = arith.constant 64 : index
    %c0_33 = arith.constant 0 : index
    %55 = vector.load %arg11[%c64, %c0_33] : memref<72x256xf32, #tpu.memory_space<vmem>>, vector<8x256xf32>
    tpu.vector_store %arg11[%c64, %c0_33], %54 {strides = array<i32>} : memref<72x256xf32, #tpu.memory_space<vmem>>, vector<8x256xf32>,
    %c0_34 = arith.constant 0 : index
    %c0_35 = arith.constant 0 : index
    %56 = vector.load %arg5[%c0_34, %c0_35] : memref<4x72xf32, #tpu.memory_space<vmem>>, vector<4x72xf32>
    %c0_36 = arith.constant 0 : index
    %c0_37 = arith.constant 0 : index
    %57 = vector.load %arg11[%c0_36, %c0_37] : memref<72x256xf32, #tpu.memory_space<vmem>>, vector<72x256xf32>
    %cst_38 = arith.constant dense<0.000000e+00> : vector<4x256xf32>
    %58 = tpu.matmul %56, %57, %cst_38 {dimension_numbers = #tpu.dot_dimension_numbers<[1], [0], [0], [1], [0, 0, 1, 1], [], []>} : vector<4x72xf32>, vector<72x256xf32>, vector<4x256xf32> -> vector<4x256xf32>
    %c0_39 = arith.constant 0 : index
    %c0_40 = arith.constant 0 : index
    %59 = vector.load %arg6[%c0_39, %c0_40] : memref<4x1xf32, #tpu.memory_space<vmem>>, vector<4x1xf32>
    %60 = vector.broadcast %59 : vector<4x1xf32> to vector<4x256xf32>
    %61 = arith.addf %58, %60 : vector<4x256xf32>
    %cst_41 = arith.constant 0.000000e+00 : f32
    %62 = vector.broadcast %cst_41 : f32 to vector<4x256xf32>
    %63 = arith.maximumf %61, %62 : vector<4x256xf32>
    %c0_42 = arith.constant 0 : index
    %c128_43 = arith.constant 128 : index
    %64 = vector.load %arg10[%c0_42, %c128_43] : memref<8x401xf32, #tpu.memory_space<vmem>>, vector<4x256xf32>
    tpu.vector_store %arg10[%c0_42, %c128_43], %63 {strides = array<i32>} : memref<8x401xf32, #tpu.memory_space<vmem>>, vector<4x256xf32>,
    %c0_44 = arith.constant 0 : index
    %c111_45 = arith.constant 111 : index
    %65 = vector.load %arg10[%c0_44, %c111_45] : memref<8x401xf32, #tpu.memory_space<vmem>>, vector<4x256xf32>
    %66 = vector.extract_strided_slice %0 {offsets = [0, 0], sizes = [1, 256], strides = [1, 1]} : vector<9x256xf32> to vector<1x256xf32>
    %67 = vector.broadcast %66 : vector<1x256xf32> to vector<4x256xf32>
    %68 = arith.mulf %65, %67 : vector<4x256xf32>
    %c0_46 = arith.constant 0 : index
    %c0_47 = arith.constant 0 : index
    %69 = vector.load %arg11[%c0_46, %c0_47] : memref<72x256xf32, #tpu.memory_space<vmem>>, vector<4x256xf32>
    tpu.vector_store %arg11[%c0_46, %c0_47], %68 {strides = array<i32>} : memref<72x256xf32, #tpu.memory_space<vmem>>, vector<4x256xf32>,
    %c0_48 = arith.constant 0 : index
    %c112_49 = arith.constant 112 : index
    %70 = vector.load %arg10[%c0_48, %c112_49] : memref<8x401xf32, #tpu.memory_space<vmem>>, vector<4x256xf32>
    %71 = vector.extract_strided_slice %0 {offsets = [1, 0], sizes = [1, 256], strides = [1, 1]} : vector<9x256xf32> to vector<1x256xf32>
    %72 = vector.broadcast %71 : vector<1x256xf32> to vector<4x256xf32>
    %73 = arith.mulf %70, %72 : vector<4x256xf32>
    %c4_50 = arith.constant 4 : index
    %c0_51 = arith.constant 0 : index
    %74 = vector.load %arg11[%c4_50, %c0_51] : memref<72x256xf32, #tpu.memory_space<vmem>>, vector<4x256xf32>
    tpu.vector_store %arg11[%c4_50, %c0_51], %73 {strides = array<i32>} : memref<72x256xf32, #tpu.memory_space<vmem>>, vector<4x256xf32>,
    %c0_52 = arith.constant 0 : index
    %c113_53 = arith.constant 113 : index
    %75 = vector.load %arg10[%c0_52, %c113_53] : memref<8x401xf32, #tpu.memory_space<vmem>>, vector<4x256xf32>
    %76 = vector.extract_strided_slice %0 {offsets = [2, 0], sizes = [1, 256], strides = [1, 1]} : vector<9x256xf32> to vector<1x256xf32>
    %77 = vector.broadcast %76 : vector<1x256xf32> to vector<4x256xf32>
    %78 = arith.mulf %75, %77 : vector<4x256xf32>
    %c8_54 = arith.constant 8 : index
    %c0_55 = arith.constant 0 : index
    %79 = vector.load %arg11[%c8_54, %c0_55] : memref<72x256xf32, #tpu.memory_space<vmem>>, vector<4x256xf32>
    tpu.vector_store %arg11[%c8_54, %c0_55], %78 {strides = array<i32>} : memref<72x256xf32, #tpu.memory_space<vmem>>, vector<4x256xf32>,
    %c0_56 = arith.constant 0 : index
    %c127_57 = arith.constant 127 : index
    %80 = vector.load %arg10[%c0_56, %c127_57] : memref<8x401xf32, #tpu.memory_space<vmem>>, vector<4x256xf32>
    %81 = vector.extract_strided_slice %0 {offsets = [3, 0], sizes = [1, 256], strides = [1, 1]} : vector<9x256xf32> to vector<1x256xf32>
    %82 = vector.broadcast %81 : vector<1x256xf32> to vector<4x256xf32>
    %83 = arith.mulf %80, %82 : vector<4x256xf32>
    %c12 = arith.constant 12 : index
    %c0_58 = arith.constant 0 : index
    %84 = vector.load %arg11[%c12, %c0_58] : memref<72x256xf32, #tpu.memory_space<vmem>>, vector<4x256xf32>
    tpu.vector_store %arg11[%c12, %c0_58], %83 {strides = array<i32>} : memref<72x256xf32, #tpu.memory_space<vmem>>, vector<4x256xf32>,
    %c0_59 = arith.constant 0 : index
    %c128_60 = arith.constant 128 : index
    %85 = vector.load %arg10[%c0_59, %c128_60] : memref<8x401xf32, #tpu.memory_space<vmem>>, vector<4x256xf32>
    %86 = vector.extract_strided_slice %0 {offsets = [4, 0], sizes = [1, 256], strides = [1, 1]} : vector<9x256xf32> to vector<1x256xf32>
    %87 = vector.broadcast %86 : vector<1x256xf32> to vector<4x256xf32>
    %88 = arith.mulf %85, %87 : vector<4x256xf32>
    %c16_61 = arith.constant 16 : index
    %c0_62 = arith.constant 0 : index
    %89 = vector.load %arg11[%c16_61, %c0_62] : memref<72x256xf32, #tpu.memory_space<vmem>>, vector<4x256xf32>
    tpu.vector_store %arg11[%c16_61, %c0_62], %88 {strides = array<i32>} : memref<72x256xf32, #tpu.memory_space<vmem>>, vector<4x256xf32>,
    %c0_63 = arith.constant 0 : index
    %c129_64 = arith.constant 129 : index
    %90 = vector.load %arg10[%c0_63, %c129_64] : memref<8x401xf32, #tpu.memory_space<vmem>>, vector<4x256xf32>
    %91 = vector.extract_strided_slice %0 {offsets = [5, 0], sizes = [1, 256], strides = [1, 1]} : vector<9x256xf32> to vector<1x256xf32>
    %92 = vector.broadcast %91 : vector<1x256xf32> to vector<4x256xf32>
    %93 = arith.mulf %90, %92 : vector<4x256xf32>
    %c20 = arith.constant 20 : index
    %c0_65 = arith.constant 0 : index
    %94 = vector.load %arg11[%c20, %c0_65] : memref<72x256xf32, #tpu.memory_space<vmem>>, vector<4x256xf32>
    tpu.vector_store %arg11[%c20, %c0_65], %93 {strides = array<i32>} : memref<72x256xf32, #tpu.memory_space<vmem>>, vector<4x256xf32>,
    %c0_66 = arith.constant 0 : index
    %c143_67 = arith.constant 143 : index
    %95 = vector.load %arg10[%c0_66, %c143_67] : memref<8x401xf32, #tpu.memory_space<vmem>>, vector<4x256xf32>
    %96 = vector.extract_strided_slice %0 {offsets = [6, 0], sizes = [1, 256], strides = [1, 1]} : vector<9x256xf32> to vector<1x256xf32>
    %97 = vector.broadcast %96 : vector<1x256xf32> to vector<4x256xf32>
    %98 = arith.mulf %95, %97 : vector<4x256xf32>
    %c24_68 = arith.constant 24 : index
    %c0_69 = arith.constant 0 : index
    %99 = vector.load %arg11[%c24_68, %c0_69] : memref<72x256xf32, #tpu.memory_space<vmem>>, vector<4x256xf32>
    tpu.vector_store %arg11[%c24_68, %c0_69], %98 {strides = array<i32>} : memref<72x256xf32, #tpu.memory_space<vmem>>, vector<4x256xf32>,
    %c0_70 = arith.constant 0 : index
    %c144_71 = arith.constant 144 : index
    %100 = vector.load %arg10[%c0_70, %c144_71] : memref<8x401xf32, #tpu.memory_space<vmem>>, vector<4x256xf32>
    %101 = vector.extract_strided_slice %0 {offsets = [7, 0], sizes = [1, 256], strides = [1, 1]} : vector<9x256xf32> to vector<1x256xf32>
    %102 = vector.broadcast %101 : vector<1x256xf32> to vector<4x256xf32>
    %103 = arith.mulf %100, %102 : vector<4x256xf32>
    %c28 = arith.constant 28 : index
    %c0_72 = arith.constant 0 : index
    %104 = vector.load %arg11[%c28, %c0_72] : memref<72x256xf32, #tpu.memory_space<vmem>>, vector<4x256xf32>
    tpu.vector_store %arg11[%c28, %c0_72], %103 {strides = array<i32>} : memref<72x256xf32, #tpu.memory_space<vmem>>, vector<4x256xf32>,
    %c0_73 = arith.constant 0 : index
    %c145_74 = arith.constant 145 : index
    %105 = vector.load %arg10[%c0_73, %c145_74] : memref<8x401xf32, #tpu.memory_space<vmem>>, vector<4x256xf32>
    %106 = vector.extract_strided_slice %0 {offsets = [8, 0], sizes = [1, 256], strides = [1, 1]} : vector<9x256xf32> to vector<1x256xf32>
    %107 = vector.broadcast %106 : vector<1x256xf32> to vector<4x256xf32>
    %108 = arith.mulf %105, %107 : vector<4x256xf32>
    %c32_75 = arith.constant 32 : index
    %c0_76 = arith.constant 0 : index
    %109 = vector.load %arg11[%c32_75, %c0_76] : memref<72x256xf32, #tpu.memory_space<vmem>>, vector<4x256xf32>
    tpu.vector_store %arg11[%c32_75, %c0_76], %108 {strides = array<i32>} : memref<72x256xf32, #tpu.memory_space<vmem>>, vector<4x256xf32>,
    %c0_77 = arith.constant 0 : index
    %c0_78 = arith.constant 0 : index
    %110 = vector.load %arg7[%c0_77, %c0_78] : memref<4x36xf32, #tpu.memory_space<vmem>>, vector<4x36xf32>
    %c0_79 = arith.constant 0 : index
    %c0_80 = arith.constant 0 : index
    %111 = vector.load %arg11[%c0_79, %c0_80] : memref<72x256xf32, #tpu.memory_space<vmem>>, vector<36x256xf32>
    %cst_81 = arith.constant dense<0.000000e+00> : vector<4x256xf32>
    %112 = tpu.matmul %110, %111, %cst_81 {dimension_numbers = #tpu.dot_dimension_numbers<[1], [0], [0], [1], [0, 0, 1, 1], [], []>} : vector<4x36xf32>, vector<36x256xf32>, vector<4x256xf32> -> vector<4x256xf32>
    %c0_82 = arith.constant 0 : index
    %c0_83 = arith.constant 0 : index
    %113 = vector.load %arg8[%c0_82, %c0_83] : memref<4x1xf32, #tpu.memory_space<vmem>>, vector<4x1xf32>
    %114 = vector.broadcast %113 : vector<4x1xf32> to vector<4x256xf32>
    %115 = arith.addf %112, %114 : vector<4x256xf32>
    %cst_84 = arith.constant 0.000000e+00 : f32
    %116 = vector.broadcast %cst_84 : f32 to vector<4x256xf32>
    %117 = arith.maximumf %115, %116 : vector<4x256xf32>
    %c0_85 = arith.constant 0 : index
    %c0_86 = arith.constant 0 : index
    %c0_87 = arith.constant 0 : index
    %118 = vector.load %arg9[%c0_85, %c0_86, %c0_87] : memref<1x4x256xf32, #tpu.memory_space<vmem>>, vector<1x4x256xf32>
    %119 = vector.shape_cast %118 : vector<1x4x256xf32> to vector<4x256xf32>
    %120 = vector.shape_cast %117 : vector<4x256xf32> to vector<1x4x256xf32>
    tpu.vector_store %arg9[%c0_85, %c0_86, %c0_87], %120 {strides = array<i32>} : memref<1x4x256xf32, #tpu.memory_space<vmem>>, vector<1x4x256xf32>,
    return
  }
  func.func @transform_0(%arg0: i32) -> (i32, i32, i32) {
    %c0_i32 = arith.constant 0 : i32
    %c0_i32_0 = arith.constant 0 : i32
    %c0_i32_1 = arith.constant 0 : i32
    return %arg0, %c0_i32, %c0_i32_0 : i32, i32, i32
  }
  func.func @transform_1(%arg0: i32) -> (i32, i32, i32) {
    %c0_i32 = arith.constant 0 : i32
    %c0_i32_0 = arith.constant 0 : i32
    %c0_i32_1 = arith.constant 0 : i32
    return %arg0, %c0_i32, %c0_i32_0 : i32, i32, i32
  }
  func.func @transform_2(%arg0: i32) -> (i32, i32) {
    %c0_i32 = arith.constant 0 : i32
    %c0_i32_0 = arith.constant 0 : i32
    %c0_i32_1 = arith.constant 0 : i32
    return %c0_i32, %c0_i32_0 : i32, i32
  }
  func.func @transform_3(%arg0: i32) -> (i32, i32) {
    %c0_i32 = arith.constant 0 : i32
    %c0_i32_0 = arith.constant 0 : i32
    %c0_i32_1 = arith.constant 0 : i32
    return %c0_i32, %c0_i32_0 : i32, i32
  }
  func.func @transform_4(%arg0: i32) -> (i32, i32) {
    %c0_i32 = arith.constant 0 : i32
    %c0_i32_0 = arith.constant 0 : i32
    %c0_i32_1 = arith.constant 0 : i32
    return %c0_i32, %c0_i32_0 : i32, i32
  }
  func.func @transform_5(%arg0: i32) -> (i32, i32) {
    %c0_i32 = arith.constant 0 : i32
    %c0_i32_0 = arith.constant 0 : i32
    %c0_i32_1 = arith.constant 0 : i32
    return %c0_i32, %c0_i32_0 : i32, i32
  }
  func.func @transform_6(%arg0: i32) -> (i32, i32) {
    %c0_i32 = arith.constant 0 : i32
    %c0_i32_0 = arith.constant 0 : i32
    %c0_i32_1 = arith.constant 0 : i32
    return %c0_i32, %c0_i32_0 : i32, i32
  }
  func.func @transform_7(%arg0: i32) -> (i32, i32) {
    %c0_i32 = arith.constant 0 : i32
    %c0_i32_0 = arith.constant 0 : i32
    %c0_i32_1 = arith.constant 0 : i32
    return %c0_i32, %c0_i32_0 : i32, i32
  }
  func.func @transform_8(%arg0: i32) -> (i32, i32, i32) {
    %c0_i32 = arith.constant 0 : i32
    %c0_i32_0 = arith.constant 0 : i32
    %c0_i32_1 = arith.constant 0 : i32
    return %arg0, %c0_i32, %c0_i32_0 : i32, i32, i32
  }
}

</mosaic_0001>

<bundles_post_ra>
// kernel: up_forward.1
= control target key start
LH: loop header
LB: loop body
LE: loop exit
PB: predicated region body
PF: predicated region fallthrough
CT: control target
= control target key end

     0   :  { %s1199_s27 = smov 0   ;;  %s1566_s0 = inlined_call_operand.vmem [shape: f32[2,4,64], index: 0, kind: input, shape index: {}]   ;;  %s1567_s1 = inlined_call_operand.vmem [shape: f32[2,4,256], index: 1, kind: input, shape index: {}]   ;;  %s1568_s2 = inlined_call_operand.vmem [shape: f32[64,256], index: 2, kind: input, shape index: {}]   ;;  %s1569_s3 = inlined_call_operand.vmem [shape: f32[9,256], index: 3, kind: input, shape index: {}]   ;;  %s1570_s4 = inlined_call_operand.vmem [shape: f32[4,72], index: 4, kind: input, shape index: {}]   ;;  %s1571_s5 = inlined_call_operand.vmem [shape: f32[4,1], index: 5, kind: input, shape index: {}]   ;;  %s1572_s6 = inlined_call_operand.vmem [shape: f32[4,36], index: 6, kind: input, shape index: {}]   ;;  %s1573_s7 = inlined_call_operand.vmem [shape: f32[4,1], index: 7, kind: input, shape index: {}]   ;;  %s1574_s8 = inlined_call_operand.vmem [shape: f32[2,4,256], index: 8, kind: output, shape index: {}]  }
   0x1 LB: > { %s1091_s28 = sadd.s32 4294967295, %s1142_s27   ;;  %p1095_p0 = scmp.ge.s32.totalorder %s1142_s27, 1  ;;  %s1142_s27 = sphi %s1199_s27, %s18_s27  }
   0x2   : > { %p271_p1 = scmp.lt.s32.totalorder %s1142_s27, 3 }
   0x4   : > { %p272_p2 = pnand %p1095_p0, %p271_p1 }
   0x5   : > { %p309_p3 = scmp.lt.s32.totalorder (!%p272_p2), %s1091_s28, 1  ;;  %s1144_s23 = smov (!%p272_p2), 17  }
   0x6   : > { %275 = sbr.rel (%p272_p2) target bundleno = 793 (0x319), region = 52  ;;  %s1145_s30 = smov (!%p272_p2), 16  }
   0x7   : > { %s1146_s29 = smov (!%p272_p2), 15   ;;  %s1148_s22 = smov (!%p272_p2), 127  }
   0x8   : > { %s1149_s24 = smov (!%p272_p2), 113   ;;  %s1150_s25 = smov (!%p272_p2), 112  }
   0x9   : > { %s1151_s26 = smov (!%p272_p2), 111  }
   0xb   : > { %v356_v0 = vld [vmem:[%s1568_s2 + $0x70] sm:$0xff]  ;;  %v357_v1 = vld [vmem:[%s1568_s2 + $0x78] sm:$0xff]  ;;  %v354_v2 = vld [vmem:[%s1568_s2 + $0x60] sm:$0xff]  ;;  %s1576_s28 = smov (!%p309_p3, %s1091_s28), 1  ;;  %vm358_vm0 = vcmask 523264   ;;  %vm330_vm1 = vcmask 138240  }
   0xc   : > { %370 = vmatpush.msra.mxu0 %v356_v0  ;;  %390 = vmatpush.msra.mxu1 %v357_v1  ;;  %v355_v3 = vld [vmem:[%s1568_s2 + $0x68] sm:$0xff]  ;;  %v1134_v4 = vld [vmem:[%s1569_s3 + $0x10] ss:$0 sm:$0xff]  ;;  %v353_v6 = vld [vmem:[%s1568_s2 + $0x58] sm:$0xff]  ;;  %s1111_s13 = sshll.u32 %s1576_s28, 3  ;;  %s1096_s18 = sshll.u32 %s1576_s28, 2 }
   0xd   : > { %v352_v5 = vld [vmem:[%s1568_s2 + $0x50] sm:$0xff]  ;;  %v1231_v7 = vld [vmem:[%s1569_s3] sm:$0xff]  ;;  %663 = vrot.lane.b32.xlu0 %v1134_v4, %s1144_s23  ;;  %v351_v10 = vld [vmem:[%s1568_s2 + $0x48] sm:$0xff]  ;;  %s317_s21 = scalar_lea.vmem %s1567_s1, %s1111_s13  ;;  %s312_s16 = scalar_lea.vmem %s1566_s0, %s1096_s18  ;;  %v1152_v36 = vmov 0.0   ;;  %vm472_vm2 = vcmask 130048   ;;  %vm525_vm3 = vcmask 1039360  }
   0xe   : > { %371 = vmatpush.msra.mxu0 %v354_v2  ;;  %391 = vmatpush.msra.mxu1 %v355_v3  ;;  %v626_v8 = vperm.slane %v1231_v7, 7  ;;  %v350_v9 = vld [vmem:[%s1568_s2 + $0x40] sm:$0xff]  ;;  %v593_v11 = vperm.slane %v1231_v7, 6  ;;  %v348_v12 = vld [vmem:[%s1568_s2 + $0x30] sm:$0xff]  ;;  %v349_v13 = vld [vmem:[%s1568_s2 + $0x38] sm:$0xff]  ;;  %v560_v26 = vperm.slane %v1231_v7, 5  ;;  %s322_s17 = scalar_lea.vmem %s1574_s8, %s1111_s13 }
   0xf   : > { %v346_v14 = vld [vmem:[%s1568_s2 + $0x20] sm:$0xff]  ;;  %v1258_v15 = vld [vmem:[%s1569_s3 + $0x8] sm:$0xff]  ;;  %v1135_v17 = vld [vmem:[%s1569_s3 + $0x18] ss:$0 sm:$0xff]  ;;  %s1147_s18 = smov 1   ;;  %v517_v28 = vperm.slane %v1231_v7, 3 }
  0x10   : > { %372 = vmatpush.msra.mxu0 %v352_v5  ;;  %392 = vmatpush.msra.mxu1 %v353_v6  ;;  %v347_v16 = vld [vmem:[%s1568_s2 + $0x28] sm:$0xff]  ;;  %v332_v18 = vld [vmem:[%s317_s21] sm:$0xff]  ;;  %v344_v19 = vld [vmem:[%s1568_s2 + $0x10] sm:$0xff]  ;;  %v627_v21 = vperm.slane %v1258_v15, 7  ;;  %v594_v25 = vperm.slane %v1258_v15, 6  ;;  %v561_v27 = vperm.slane %v1258_v15, 5 }
  0x11   : > { %630 = vrot.lane.b32.xlu1 %v626_v8, %s1145_s30  ;;  %597 = vrot.lane.b32.xlu2 %v593_v11, %s1146_s29  ;;  %334 = vst [vmem:[#allocation1] ss:$2 sm:$0xff] %v332_v18  ;;  %v345_v20 = vld [vmem:[%s1568_s2 + $0x18] sm:$0xff]  ;;  %v342_v22 = vld [vmem:[%s1568_s2] sm:$0xff]  ;;  %v518_v29 = vperm.slane %v1258_v15, 3  ;;  %v482_v30 = vperm.slane %v1231_v7, 2 }
  0x12   : > { %373 = vmatpush.msra.mxu0 %v350_v9  ;;  %393 = vmatpush.msra.mxu1 %v351_v10  ;;  %v343_v23 = vld [vmem:[%s1568_s2 + $0x8] sm:$0xff]  ;;  %v341_v24 = vld [vmem:[%s312_s16] sm:$0xf]  ;;  %v483_v31 = vperm.slane %v1258_v15, 2  ;;  %v447_v32 = vperm.slane %v1231_v7, 1  ;;  %v448_v33 = vperm.slane %v1258_v15, 1 }
  0x13   : > { %v413_v34 = vperm.slane %v1231_v7, 0  ;;  %v414_v35 = vperm.slane %v1258_v15, 0  ;;  %327 = vst [vmem:[#allocation2] sm:$0xff] %v1152_v36  ;;  %v551_v62 = vperm.slane %v1231_v7, 4  ;;  %v552_v1 = vperm.slane %v1258_v15, 4 }
  0x14   : > { %374 = vmatpush.msra.mxu0 %v348_v12  ;;  %394 = vmatpush.msra.mxu1 %v349_v13  ;;  %331 = vst.msk [vmem:[#allocation2 + $0x18] sm:$0xff] %vm330_vm1, %v1152_v36  ;;  %vm507_vm4 = vcmask 121856   ;;  %v1153_v10 = vmov 0   ;;  %vm542_vm5 = vcmask 7168   ;;  %vm490_vm6 = vcmask 924672  }
  0x15   : > { %665 = vrot.lane.b32.xlu0 %v1135_v17, %s1144_s23  ;;  %328 = vst [vmem:[#allocation2 + $0x8] sm:$0xff] %v1152_v36  ;;  %1131 = vset.pattern.permute.xlu1 %v1153_v10  ;;  %vm455_vm7 = vcmask 916480   ;;  %vm421_vm8 = vcmask 908288   ;;  %vm714_vm9 = vcmask 588800   ;;  %vm969_vm10 = vcmask 1043456  }
  0x16   : > { %375 = vmatpush.msra.mxu0 %v346_v14  ;;  %395 = vmatpush.msra.mxu1 %v347_v16  ;;  %329 = vst [vmem:[#allocation2 + $0x10] sm:$0xff] %v1152_v36  ;;  %vm965_vm11 = vcmask 293888  }
  0x17   : > { %1132 = vset.pattern.permute.xlu2 %v1153_v10  ;;  %1133 = vset.pattern.permute.xlu0 %v1153_v10 }
  0x18   : > { %376 = vmatpush.msra.mxu0 %v344_v19  ;;  %396 = vmatpush.msra.mxu1 %v345_v20  ;;  %v335_v38 = vld.sshfl [vmem:[#allocation1] sm:$0xff pattern:$0x75316420]  ;;  %v336_v39 = vld.sshfl [vmem:[#allocation1 + $0x8] sm:$0xff pattern:$0x75316420] }
  0x19   : > { %632 = vrot.lane.b32.xlu1 %v627_v21, %s1145_s30  ;;  %599 = vrot.lane.b32.xlu2 %v594_v25, %s1146_s29  ;;  %339 = vst [vmem:[#allocation2 + $0x8] sm:$0xf] %v335_v38 }
  0x1a   : > { %377 = vmatpush.msra.mxu0 %v342_v22  ;;  %397 = vmatpush.msra.mxu1 %v343_v23  ;;  %340 = vst [vmem:[#allocation2 + $0x10] sm:$0xf] %v336_v39 }
  0x1b   : > { %1101 = vmatmul.msk.f32.vlgmr.msra.gmra.mxu0 %vm358_vm0, %v341_v24  ;;  %1102 = vmatmul.msk.f32.vlgmr.msra.gmra.mxu1 %vm358_vm0, %v341_v24  ;;  %v658_v43 = vld [vmem:[#allocation2 + $0x18] sm:$0xff] }
  0x1d   : > { %564 = vrot.lane.b32.xlu0 %v560_v26, %s1147_s18 }
  0x21   : > { %566 = vrot.lane.b32.xlu1 %v561_v27, %s1147_s18  ;;  %521 = vrot.lane.b32.xlu2 %v517_v28, %s1148_s22 }
  0x25   : > { %523 = vrot.lane.b32.xlu0 %v518_v29, %s1148_s22 }
  0x29   : > { %486 = vrot.lane.b32.xlu1 %v482_v30, %s1149_s24  ;;  %488 = vrot.lane.b32.xlu2 %v483_v31, %s1149_s24  ;;  %v884_v31 = vld [vmem:[#allocation2 + $0x18] sm:$0xf] }
  0x2d   : > { %451 = vrot.lane.b32.xlu0 %v447_v32, %s1150_s25 }
  0x31   : > { %453 = vrot.lane.b32.xlu1 %v448_v33, %s1150_s25  ;;  %417 = vrot.lane.b32.xlu2 %v413_v34, %s1151_s26  ;;  %v708_v33 = vld [vmem:[%s1571_s5] sm:$0xf] }
  0x35   : > { %419 = vrot.lane.b32.xlu0 %v414_v35, %s1151_s26  ;;  %v905_v35 = vld [vmem:[#allocation2 + $0x18] sm:$0xf] }
  0x6b   : > { %v1314_v37 = vpop.permute.xlu2 %597 }
  0x73   : > { %v1320_v42 = vpop.permute.xlu2 %599 }
  0x74   : > { %v607_v50 = vmul.f32 %v658_v43, %v1320_v42  ;;  %v1387_v11 = vsel %vm507_vm4, %v1314_v37, %v1320_v42  ;;  %v887_v34 = vmul.f32 %v884_v31, %v1320_v42 }
  0x7b   : > { %v1329_v48 = vpop.permute.xlu2 %521 }
  0x7c   : > { %v530_v49 = vmul.f32 0.0, %v1329_v48 }
  0x7f   : > { %v1316_v40 = vpop.permute.xlu0 %663 }
  0x83   : > { %v1318_v41 = vpop.permute.xlu1 %630  ;;  %v1398_v16 = vpop.permute.xlu2 %488 }
  0x87   : > { %v1322_v44 = vpop.permute.xlu0 %665 }
  0x88   : > { %v673_v45 = vmul.f32 %v1322_v44, %v658_v43  ;;  %v1349_v60 = vsel %vm330_vm1, %v1316_v40, %v1322_v44 }
  0x8a   : > { %681 = vrot.lane.b32.xlu2 %v673_v45, %s1151_s26  ;;  %v860_v45 = vld [vmem:[#allocation2 + $0x18] sm:$0xf] }
  0x8b   : > { %v1325_v46 = vpop.permute.xlu1 %632  ;;  %v1449_v38 = vpop.permute.xlu2 %417 }
  0x8c   : > { %v640_v47 = vmul.f32 %v658_v43, %v1325_v46  ;;  %v1360_v2 = vsel %vm472_vm2, %v1318_v41, %v1325_v46  ;;  %v908_v39 = vmul.f32 %v905_v35, %v1325_v46  ;;  %v807_v46 = vld [vmem:[#allocation2] sm:$0xf] }
  0x8e   : > { %648 = vrot.lane.b32.xlu1 %v640_v47, %s1150_s25  ;;  %v914_v42 = vrot.slane %v908_v39, 4 }
  0x8f   : > { %v1341_v58 = vpop.permute.xlu0 %564 }
  0x92   : > { %536 = vrot.lane.b32.xlu2 %v530_v49, %s1147_s18 }
  0x93   : > { %v1334_v51 = vpop.permute.xlu1 %566 }
  0x94   : > { %v574_v56 = vmul.f32 %v658_v43, %v1334_v51  ;;  %v1403_v17 = vsel %vm542_vm5, %v1341_v58, %v1334_v51  ;;  %v863_v49 = vmul.f32 %v860_v45, %v1334_v51 }
  0x96   : > { %615 = vrot.lane.b32.xlu1 %v607_v50, %s1149_s24  ;;  %v869_v50 = vrot.slane %v863_v49, 4 }
  0x97   : > { %v1364_v5 = vpop.permute.xlu0 %523 }
  0x98   : > { %v379_v52 = vpop.f32.mrf.mxu0  ;;  %v399_v53 = vpop.f32.mrf.mxu1  ;;  %v1371_v6 = vsel %vm525_vm3, %v1329_v48, %v1364_v5 }
  0x99   : > { %v404_v54 = vrot.slane %v379_v52, 4  ;;  %v405_v55 = vrot.slane %v399_v53, 4  ;;  %v426_v52 = vmul.f32 0.0, %v1449_v38  ;;  %v929_v53 = vld [vmem:[#allocation2 + $0x18] sm:$0xf] }
  0x9b   : > { %408 = vst [vmem:[#allocation2 + $0x8] sm:$0xf0] %v404_v54  ;;  %v1339_v57 = vpop.permute.xlu1 %486 }
  0x9c   : > { %409 = vst [vmem:[#allocation2 + $0x10] sm:$0xf0] %v405_v55  ;;  %v495_v59 = vmul.f32 0.0, %v1339_v57  ;;  %v1429_v28 = vsel %vm490_vm6, %v1339_v57, %v1398_v16  ;;  %v810_v54 = vmul.f32 %v807_v46, %v1339_v57  ;;  %v932_v55 = vmul.f32 %v929_v53, %v1322_v44  ;;  %v689_v46 = vld [vmem:[%s1570_s4] sm:$0xf] }
  0x9e   : > { %582 = vrot.lane.b32.xlu1 %v574_v56, %s1148_s22  ;;  %501 = vrot.lane.b32.xlu2 %v495_v59, %s1146_s29 }
  0x9f   : > { %v1411_v21 = vpop.permute.xlu0 %451 }
  0xa0   : > { %v460_v27 = vmul.f32 0.0, %v1411_v21 }
  0xa2   : > { %v1351_v61 = vld [vmem:[#allocation2 + $0x8] sm:$0xff] }
  0xa3   : > { %v481_v63 = vld [vmem:[#allocation2 + $0x10] sm:$0xff]  ;;  %v671_v0 = vmul.f32 %v1316_v40, %v1351_v61  ;;  %v1381_v9 = vmul.f32 %v1351_v61, %v551_v62  ;;  %v531_v12 = vmul.f32 %v1351_v61, %v1371_v6  ;;  %v638_v13 = vmul.f32 %v1351_v61, %v1318_v41  ;;  %v1414_v22 = vpop.permute.xlu1 %453 }
  0xa4   : > { %v672_v3 = vmul.f32 %v1349_v60, %v481_v63  ;;  %v639_v4 = vmul.f32 %v1360_v2, %v481_v63  ;;  %v1376_v8 = vmul.f32 %v552_v1, %v481_v63  ;;  %v606_v14 = vmul.f32 %v1387_v11, %v481_v63 }
  0xa5   : > { %555 = vst [vmem:[#allocation3 + $0x88] sm:$0xff] %v1381_v9  ;;  %v497_v18 = vmul.f32 %v1398_v16, %v481_v63  ;;  %v605_v19 = vmul.f32 %v1351_v61, %v1314_v37  ;;  %v573_v20 = vmul.f32 %v1403_v17, %v481_v63  ;;  %v462_v23 = vmul.f32 %v481_v63, %v1414_v22 }
  0xa6   : > { %679 = vrot.lane.b32.xlu1 %v672_v3, %s1151_s26  ;;  %677 = vrot.lane.b32.xlu2 %v671_v0, %s1151_s26  ;;  %556 = vst [vmem:[#allocation3 + $0x40] sm:$0xff] %v1376_v8  ;;  %v532_v24 = vmul.f32 %v1364_v5, %v481_v63  ;;  %v572_v25 = vmul.f32 %v1351_v61, %v1341_v58 }
  0xa7   : > { %646 = vrot.lane.b32.xlu0 %v639_v4, %s1150_s25  ;;  %v1423_v26 = vpop.permute.xlu0 %419  ;;  %v496_v30 = vmul.f32 %v1351_v61, %v1429_v28  ;;  %v1440_v32 = vsel %vm455_vm7, %v1411_v21, %v1414_v22 }
  0xa8   : > { %v428_v29 = vmul.f32 %v481_v63, %v1423_v26  ;;  %v461_v36 = vmul.f32 %v1351_v61, %v1440_v32  ;;  %v1456_v43 = vsel %vm421_vm8, %v1449_v38, %v1423_v26 }
  0xa9   : > { %v427_v47 = vmul.f32 %v1351_v61, %v1456_v43 }
  0xae   : > { %644 = vrot.lane.b32.xlu2 %v638_v13, %s1150_s25  ;;  %538 = vrot.lane.b32.xlu1 %v531_v12, %s1147_s18 }
  0xaf   : > { %613 = vrot.lane.b32.xlu0 %v606_v14, %s1149_s24 }
  0xb6   : > { %611 = vrot.lane.b32.xlu2 %v605_v19, %s1149_s24  ;;  %505 = vrot.lane.b32.xlu1 %v497_v18, %s1146_s29 }
  0xb7   : > { %580 = vrot.lane.b32.xlu0 %v573_v20, %s1148_s22 }
  0xbe   : > { %540 = vrot.lane.b32.xlu2 %v532_v24, %s1147_s18  ;;  %470 = vrot.lane.b32.xlu1 %v462_v23, %s1145_s30 }
  0xbf   : > { %578 = vrot.lane.b32.xlu0 %v572_v25, %s1148_s22 }
  0xc6   : > { %466 = vrot.lane.b32.xlu2 %v460_v27, %s1145_s30  ;;  %436 = vrot.lane.b32.xlu1 %v428_v29, %s1144_s23 }
  0xc7   : > { %503 = vrot.lane.b32.xlu0 %v496_v30, %s1146_s29 }
  0xce   : > { %895 = vrot.lane.b32.xlu2 %v887_v34, %s1149_s24  ;;  %711 = vperm.xlu1 %1131, %v708_v33  }
  0xcf   : > { %468 = vrot.lane.b32.xlu0 %v461_v36, %s1145_s30 }
  0xd6   : > { %919 = vrot.lane.b32.xlu1 %v914_v42, %s1150_s25 }
  0xd7   : > { %434 = vrot.lane.b32.xlu0 %v427_v47, %s1144_s23 }
  0xde   : > { %874 = vrot.lane.b32.xlu1 %v869_v50, %s1148_s22 }
  0xdf   : > { %432 = vrot.lane.b32.xlu0 %v426_v52, %s1144_s23 }
  0xe4   : > { %v682_v56 = vpop.permute.xlu2 %681 }
  0xe6   : > { %816 = vrot.lane.b32.xlu1 %v810_v54, %s1146_s29 }
  0xe7   : > { %940 = vrot.lane.b32.xlu0 %v932_v55, %s1151_s26 }
  0xec   : > { %v537_v59 = vpop.permute.xlu2 %536 }
  0xf8   : > { %v502_v51 = vpop.permute.xlu2 %501 }
 0x100   : > { %v649_v61 = vpop.permute.xlu1 %648  ;;  %v678_v63 = vpop.permute.xlu2 %677 }
 0x108   : > { %v616_v0 = vpop.permute.xlu1 %615  ;;  %v645_v3 = vpop.permute.xlu2 %644 }
 0x110   : > { %v583_v4 = vpop.permute.xlu1 %582  ;;  %v612_v10 = vpop.permute.xlu2 %611 }
 0x118   : > { %v680_v12 = vpop.permute.xlu1 %679  ;;  %v541_v20 = vpop.permute.xlu2 %540 }
 0x119   : > { %v683_v13 = vsel %vm421_vm8, %v678_v63, %v680_v12  ;;  %v684_v57 = vsel %vm421_vm8, %v680_v12, %v682_v56  ;;  %v647_v14 = vpop.permute.xlu0 %646 }
 0x11a   : > { %v650_v44 = vsel %vm455_vm7, %v645_v3, %v647_v14  ;;  %v651_v18 = vsel %vm455_vm7, %v647_v14, %v649_v61  ;;  %725 = vmatpush.msra.mxu2 %v683_v13  ;;  %745 = vmatpush.msra.mxu3 %v684_v57 }
 0x11c   : > { %726 = vmatpush.msra.mxu2 %v650_v44  ;;  %746 = vmatpush.msra.mxu3 %v651_v18 }
 0x120   : > { %v539_v19 = vpop.permute.xlu1 %538 }
 0x121   : > { %v614_v23 = vpop.permute.xlu0 %613  ;;  %v543_v24 = vsel %vm542_vm5, %v537_v59, %v539_v19  ;;  %v544_v29 = vsel %vm542_vm5, %v539_v19, %v541_v20 }
 0x122   : > { %v617_v25 = vsel %vm490_vm6, %v612_v10, %v614_v23  ;;  %v618_v27 = vsel %vm490_vm6, %v614_v23, %v616_v0  ;;  %547 = vst [vmem:[#allocation3 + $0x70] sm:$0xff] %v543_v24 }
 0x123   : > { %727 = vmatpush.msra.mxu2 %v617_v25  ;;  %747 = vmatpush.msra.mxu3 %v618_v27  ;;  %548 = vst [vmem:[#allocation3 + $0x80] sm:$0xff] %v544_v29 }
 0x128   : > { %v506_v35 = vpop.permute.xlu1 %505 }
 0x129   : > { %v581_v30 = vpop.permute.xlu0 %580 }
 0x12a   : > { %v585_v31 = vsel %vm525_vm3, %v581_v30, %v583_v4 }
 0x12b   : > { %748 = vmatpush.msra.mxu3 %v585_v31 }
 0x12d   : > { %749 = vmatpush.msra.mxu3 %v1376_v8  ;;  %v467_v8 = vpop.permute.xlu2 %466 }
 0x12f   : > { %750 = vmatpush.msra.mxu3 %v544_v29 }
 0x130   : > { %v471_v45 = vpop.permute.xlu1 %470 }
 0x131   : > { %v579_v33 = vpop.permute.xlu0 %578 }
 0x132   : > { %v584_v34 = vsel %vm525_vm3, %v579_v33, %v581_v30 }
 0x133   : > { %728 = vmatpush.msra.mxu2 %v584_v34 }
 0x135   : > { %729 = vmatpush.msra.mxu2 %v1381_v9 }
 0x137   : > { %730 = vmatpush.msra.mxu2 %v543_v24 }
 0x138   : > { %v437_v9 = vpop.permute.xlu1 %436 }
 0x139   : > { %v504_v36 = vpop.permute.xlu0 %503 }
 0x13a   : > { %v508_v39 = vsel %vm507_vm4, %v502_v51, %v504_v36  ;;  %v509_v42 = vsel %vm507_vm4, %v504_v36, %v506_v35 }
 0x13b   : > { %512 = vst [vmem:[#allocation3 + $0x20] sm:$0xff] %v508_v39  ;;  %731 = vmatpush.msra.mxu2 %v508_v39  ;;  %751 = vmatpush.msra.mxu3 %v509_v42 }
 0x13c   : > { %513 = vst [vmem:[#allocation3 + $0x8] sm:$0xff] %v509_v42 }
 0x140   : > { %v712_v56 = vpop.permute.xlu1 %711 }
 0x141   : > { %v469_v47 = vpop.permute.xlu0 %468 }
 0x142   : > { %v473_v49 = vsel %vm472_vm2, %v467_v8, %v469_v47  ;;  %v474_v50 = vsel %vm472_vm2, %v469_v47, %v471_v45 }
 0x143   : > { %477 = vst [vmem:[#allocation3 + $0x78] sm:$0xff] %v473_v49  ;;  %732 = vmatpush.msra.mxu2 %v473_v49  ;;  %752 = vmatpush.msra.mxu3 %v474_v50 }
 0x144   : > { %478 = vst [vmem:[#allocation3 + $0x58] sm:$0xff] %v474_v50  ;;  %v828_v50 = vld [vmem:[#allocation2] sm:$0xf] }
 0x149   : > { %v435_v52 = vpop.permute.xlu0 %434 }
 0x14a   : > { %v439_v53 = vsel %vm330_vm1, %v435_v52, %v437_v9  ;;  %v831_v9 = vmul.f32 %v828_v50, %v1329_v48 }
 0x14b   : > { %443 = vst [vmem:[#allocation3 + $0x38] sm:$0xff] %v439_v53  ;;  %753 = vmatpush.msra.mxu3 %v439_v53 }
 0x14c   : > { %1104 = vmatmul.msk.f32.vlgmr.msra.gmra.mxu3 %vm714_vm9, %v689_v46 }
 0x151   : > { %v433_v54 = vpop.permute.xlu0 %432 }
 0x152   : > { %v438_v55 = vsel %vm330_vm1, %v433_v54, %v435_v52  ;;  %v896_v54 = vpop.permute.xlu2 %895 }
 0x153   : > { %442 = vst [vmem:[#allocation3] sm:$0xff] %v438_v55  ;;  %733 = vmatpush.msra.mxu2 %v438_v55  ;;  %v920_v55 = vpop.permute.xlu1 %919 }
 0x154   : > { %1103 = vmatmul.msk.f32.vlgmr.msra.gmra.mxu2 %vm714_vm9, %v689_v46  ;;  %v837_v46 = vrot.slane %v831_v9, 4 }
 0x15b   : > { %v875_v48 = vpop.permute.xlu1 %874 }
 0x1cf   : > { %v755_v59 = vpop.f32.mrf.mxu3 }
 0x1d0   : > { %v756_v51 = vadd.f32 %v755_v59, %v712_v56 }
 0x1d2   : > { %v759_v61 = vmax.f32 %v756_v51, 0.0 }
 0x1d4   : > { %761 = vst [vmem:[#allocation2 + $0x10] sm:$0xf] %v759_v61 }
 0x1d7   : > { %v735_v63 = vpop.f32.mrf.mxu2 }
 0x1d8   : > { %v736_v0 = vadd.f32 %v735_v63, %v712_v56  ;;  %v941_v56 = vpop.permute.xlu0 %940 }
 0x1da   : > { %v758_v3 = vmax.f32 %v736_v0, 0.0  ;;  %v817_v0 = vpop.permute.xlu1 %816 }
 0x1db   : > { %v928_v4 = vld [vmem:[#allocation2 + $0x10] sm:$0xf] }
 0x1dc   : > { %v883_v10 = vld [vmem:[#allocation2 + $0x10] sm:$0xf]  ;;  %760 = vst [vmem:[#allocation2 + $0x8] sm:$0xf] %v758_v3  ;;  %v931_v12 = vmul.f32 %v928_v4, %v1349_v60 }
 0x1dd   : > { %v886_v13 = vmul.f32 %v883_v10, %v1387_v11  ;;  %v853_v57 = vld [vmem:[#allocation2 + $0x10] sm:$0xf] }
 0x1de   : > { %938 = vrot.lane.b32.xlu2 %v931_v12, %s1151_s26  ;;  %v855_v14 = vmul.f32 %v853_v57, %v552_v1  ;;  %v904_v11 = vld [vmem:[#allocation2 + $0x10] sm:$0xf] }
 0x1df   : > { %893 = vrot.lane.b32.xlu1 %v886_v13, %s1149_s24  ;;  %v764_v25 = vld [vmem:[#allocation2 + $0x10] sm:$0xf] }
 0x1e0   : > { %857 = vst [vmem:[#allocation3 + $0x8] sm:$0xf] %v855_v14  ;;  %v830_v29 = vld [vmem:[#allocation2 + $0x10] sm:$0xf] }
 0x1e1   : > { %v859_v30 = vld [vmem:[#allocation2 + $0x10] sm:$0xf]  ;;  %v833_v7 = vmul.f32 %v830_v29, %v1364_v5 }
 0x1e2   : > { %v862_v31 = vmul.f32 %v859_v30, %v1403_v17 }
 0x1e3   : > { %v927_v44 = vld [vmem:[#allocation2 + $0x8] sm:$0xf]  ;;  %v839_v33 = vrot.slane %v833_v7, 4 }
 0x1e4   : > { %v808_v18 = vld [vmem:[#allocation2 + $0x8] sm:$0xf]  ;;  %v930_v20 = vmul.f32 %v927_v44, %v1316_v40  ;;  %v907_v40 = vmul.f32 %v904_v11, %v1360_v2  ;;  %v868_v34 = vrot.slane %v862_v31, 4 }
 0x1e5   : > { %v763_v19 = vld [vmem:[#allocation2 + $0x8] sm:$0xf]  ;;  %v811_v23 = vmul.f32 %v808_v18, %v1429_v28 }
 0x1e6   : > { %v766_v60 = vmul.f32 %v763_v19, %v1456_v43  ;;  %v852_v24 = vld [vmem:[#allocation2 + $0x8] sm:$0xf]  ;;  %936 = vrot.lane.b32.xlu2 %v930_v20, %s1151_s26  ;;  %v767_v43 = vmul.f32 %v764_v25, %v1423_v26  ;;  %v913_v27 = vrot.slane %v907_v40, 4 }
 0x1e7   : > { %818 = vrot.lane.b32.xlu1 %v811_v23, %s1146_s29  ;;  %v854_v15 = vmul.f32 %v852_v24, %v551_v62  ;;  %v882_v1 = vld [vmem:[#allocation2 + $0x8] sm:$0xf]  ;;  %v809_v62 = vld [vmem:[#allocation2 + $0x10] sm:$0xf] }
 0x1e8   : > { %773 = vrot.lane.b32.xlu0 %v766_v60, %s1144_s23  ;;  %v885_v28 = vmul.f32 %v882_v1, %v1314_v37  ;;  %v812_v2 = vmul.f32 %v809_v62, %v1398_v16  ;;  %v783_v37 = vld [vmem:[#allocation2] sm:$0xf]  ;;  %v858_v26 = vld [vmem:[#allocation2 + $0x8] sm:$0xf]  ;;  %v959_v62 = vld [vmem:[%s1573_s7] sm:$0xf] }
 0x1e9   : > { %856 = vst [vmem:[#allocation3 + $0x20] sm:$0xf] %v854_v15  ;;  %v903_v35 = vld [vmem:[#allocation2 + $0x8] sm:$0xf]  ;;  %v786_v36 = vmul.f32 %v783_v37, %v1411_v21  ;;  %v861_v5 = vmul.f32 %v858_v26, %v1341_v58 }
 0x1ea   : > { %v906_v39 = vmul.f32 %v903_v35, %v1318_v41  ;;  %v784_v45 = vld [vmem:[#allocation2 + $0x8] sm:$0xf]  ;;  %v785_v41 = vld [vmem:[#allocation2 + $0x10] sm:$0xf] }
 0x1eb   : > { %v867_v17 = vrot.slane %v861_v5, 4  ;;  %v792_v42 = vrot.slane %v786_v36, 4  ;;  %v829_v8 = vld [vmem:[#allocation2 + $0x8] sm:$0xf]  ;;  %v787_v47 = vmul.f32 %v784_v45, %v1440_v32  ;;  %v788_v52 = vmul.f32 %v785_v41, %v1414_v22  ;;  %v762_v32 = vld [vmem:[#allocation2] sm:$0xf] }
 0x1ec   : > { %v912_v16 = vrot.slane %v906_v39, 4  ;;  %v832_v49 = vmul.f32 %v829_v8, %v1371_v6  ;;  %v765_v6 = vmul.f32 %v762_v32, %v1449_v38 }
 0x1ed   : > { %v793_v21 = vrot.slane %v787_v47, 4  ;;  %v794_v53 = vrot.slane %v788_v52, 4 }
 0x1ee   : > { %891 = vrot.lane.b32.xlu2 %v885_v28, %s1149_s24  ;;  %v838_v58 = vrot.slane %v832_v49, 4 }
 0x1ef   : > { %775 = vrot.lane.b32.xlu1 %v767_v43, %s1144_s23 }
 0x1f0   : > { %917 = vrot.lane.b32.xlu0 %v913_v27, %s1150_s25 }
 0x1f6   : > { %820 = vrot.lane.b32.xlu2 %v812_v2, %s1146_s29 }
 0x1f7   : > { %844 = vrot.lane.b32.xlu1 %v839_v33, %s1147_s18 }
 0x1f8   : > { %872 = vrot.lane.b32.xlu0 %v868_v34, %s1148_s22 }
 0x1fe   : > { %870 = vrot.lane.b32.xlu2 %v867_v17, %s1148_s22 }
 0x1ff   : > { %795 = vrot.lane.b32.xlu1 %v792_v42, %s1145_s30  ;;  %v948_v42 = vld [vmem:[%s1572_s6] sm:$0xf] }
 0x200   : > { %915 = vrot.lane.b32.xlu0 %v912_v16, %s1150_s25 }
 0x206   : > { %797 = vrot.lane.b32.xlu2 %v793_v21, %s1145_s30 }
 0x208   : > { %842 = vrot.lane.b32.xlu0 %v838_v58, %s1147_s18 }
 0x20e   : > { %840 = vrot.lane.b32.xlu2 %v837_v46, %s1147_s18 }
 0x210   : > { %799 = vrot.lane.b32.xlu0 %v794_v53, %s1145_s30 }
 0x216   : > { %962 = vperm.xlu2 %1132, %v959_v62  }
 0x218   : > { %771 = vrot.lane.b32.xlu0 %v765_v6, %s1144_s23 }
 0x238   : > { %v939_v59 = vpop.permute.xlu2 %938 }
 0x239   : > { %v943_v51 = vsel %vm421_vm8, %v939_v59, %v941_v56 }
 0x23a   : > { %947 = vst [vmem:[#allocation3 + $0x40] sm:$0xf] %v943_v51 }
 0x240   : > { %v937_v22 = vpop.permute.xlu2 %936 }
 0x241   : > { %v942_v61 = vsel %vm421_vm8, %v937_v22, %v939_v59  ;;  %v958_v63 = vld [vmem:[#allocation3 + $0x40] sm:$0xf] }
 0x242   : > { %946 = vst [vmem:[#allocation3 + $0x88] sm:$0xf] %v942_v61  ;;  %1107 = vmatpush.msk.msrb.mxu1 %vm969_vm10, %v958_v63 }
 0x248   : > { %v892_v3 = vpop.permute.xlu2 %891 }
 0x249   : > { %v957_v38 = vld [vmem:[#allocation3 + $0x88] sm:$0xf] }
 0x24a   : > { %1105 = vmatpush.msk.msrb.mxu0 %vm969_vm10, %v957_v38 }
 0x250   : > { %v821_v13 = vpop.permute.xlu2 %820 }
 0x251   : > { %v894_v4 = vpop.permute.xlu1 %893 }
 0x252   : > { %v897_v10 = vsel %vm490_vm6, %v892_v3, %v894_v4  ;;  %v898_v12 = vsel %vm490_vm6, %v894_v4, %v896_v54 }
 0x253   : > { %901 = vst [vmem:[#allocation3 + $0x70] sm:$0xf] %v897_v10 }
 0x254   : > { %902 = vst [vmem:[#allocation3 + $0x80] sm:$0xf] %v898_v12 }
 0x258   : > { %v871_v24 = vpop.permute.xlu2 %870 }
 0x259   : > { %v819_v57 = vpop.permute.xlu1 %818 }
 0x25a   : > { %v822_v14 = vsel %vm507_vm4, %v817_v0, %v819_v57  ;;  %v823_v44 = vsel %vm507_vm4, %v819_v57, %v821_v13  ;;  %v774_v18 = vpop.permute.xlu0 %773 }
 0x25b   : > { %826 = vst [vmem:[#allocation3 + $0x78] sm:$0xf] %v822_v14 }
 0x25c   : > { %827 = vst [vmem:[#allocation3 + $0x58] sm:$0xf] %v823_v44 }
 0x260   : > { %v798_v28 = vpop.permute.xlu2 %797 }
 0x261   : > { %v776_v19 = vpop.permute.xlu1 %775 }
 0x262   : > { %v778_v20 = vsel %vm330_vm1, %v774_v18, %v776_v19  ;;  %v918_v23 = vpop.permute.xlu0 %917 }
 0x263   : > { %782 = vst [vmem:[#allocation3 + $0x38] sm:$0xf] %v778_v20  ;;  %v922_v60 = vsel %vm455_vm7, %v918_v23, %v920_v55 }
 0x264   : > { %926 = vst [vmem:[#allocation3 + $0x80] sm:$0xf0] %v922_v60 }
 0x268   : > { %v841_v31 = vpop.permute.xlu2 %840 }
 0x269   : > { %v845_v11 = vpop.permute.xlu1 %844 }
 0x26a   : > { %v873_v15 = vpop.permute.xlu0 %872 }
 0x26b   : > { %v876_v1 = vsel %vm525_vm3, %v871_v24, %v873_v15  ;;  %v877_v25 = vsel %vm525_vm3, %v873_v15, %v875_v48  ;;  %v956_v40 = vld [vmem:[#allocation3 + $0x80] sm:$0xff] }
 0x26c   : > { %880 = vst [vmem:[#allocation3 + $0x20] sm:$0xf0] %v876_v1  ;;  %1008 = vmatpush.msrb.mxu1 %v956_v40 }
 0x26d   : > { %881 = vst [vmem:[#allocation3 + $0x8] sm:$0xf0] %v877_v25 }
 0x270   : > { %v963_v47 = vpop.permute.xlu2 %962 }
 0x271   : > { %v796_v43 = vpop.permute.xlu1 %795 }
 0x272   : > { %v801_v27 = vsel %vm472_vm2, %v796_v43, %v798_v28  ;;  %v916_v29 = vpop.permute.xlu0 %915 }
 0x273   : > { %805 = vst [vmem:[#allocation3] sm:$0xf0] %v801_v27  ;;  %v921_v30 = vsel %vm455_vm7, %v916_v29, %v918_v23  ;;  %v953_v26 = vld [vmem:[#allocation3 + $0x20] sm:$0xff] }
 0x274   : > { %925 = vst [vmem:[#allocation3 + $0x70] sm:$0xf0] %v921_v30  ;;  %v954_v7 = vld [vmem:[#allocation3 + $0x8] sm:$0xff] }
 0x275   : > { %1009 = vmatpush.msrb.mxu1 %v954_v7 }
 0x27a   : > { %v843_v2 = vpop.permute.xlu0 %842 }
 0x27b   : > { %v846_v33 = vsel %vm542_vm5, %v841_v31, %v843_v2  ;;  %v847_v37 = vsel %vm542_vm5, %v843_v2, %v845_v11  ;;  %v955_v34 = vld [vmem:[#allocation3 + $0x70] sm:$0xff] }
 0x27c   : > { %850 = vst [vmem:[#allocation3 + $0x78] sm:$0xf0] %v846_v33  ;;  %988 = vmatpush.msrb.mxu0 %v955_v34 }
 0x27d   : > { %851 = vst [vmem:[#allocation3 + $0x58] sm:$0xf0] %v847_v37 }
 0x27e   : > { %989 = vmatpush.msrb.mxu0 %v953_v26 }
 0x282   : > { %v800_v35 = vpop.permute.xlu0 %799 }
 0x283   : > { %v802_v36 = vsel %vm472_vm2, %v798_v28, %v800_v35  ;;  %v951_v5 = vld [vmem:[#allocation3 + $0x78] sm:$0xff] }
 0x284   : > { %806 = vst [vmem:[#allocation3 + $0x38] sm:$0xf0] %v802_v36  ;;  %990 = vmatpush.msrb.mxu0 %v951_v5  ;;  %v952_v39 = vld [vmem:[#allocation3 + $0x58] sm:$0xff] }
 0x285   : > { %1010 = vmatpush.msrb.mxu1 %v952_v39 }
 0x28a   : > { %v772_v17 = vpop.permute.xlu0 %771 }
 0x28b   : > { %v777_v16 = vsel %vm330_vm1, %v772_v17, %v774_v18  ;;  %v950_v45 = vld [vmem:[#allocation3 + $0x38] sm:$0xff] }
 0x28c   : > { %781 = vst [vmem:[#allocation3] sm:$0xf] %v777_v16  ;;  %1011 = vmatpush.msrb.mxu1 %v950_v45 }
 0x28d   : > { %1108 = vmatmul.msk.f32.vlgmr.msrb.gmra.mxu1 %vm965_vm11, %v948_v42 }
 0x293   : > { %v949_v8 = vld [vmem:[#allocation3] sm:$0xff] }
 0x294   : > { %991 = vmatpush.msrb.mxu0 %v949_v8 }
 0x295   : > { %1106 = vmatmul.msk.f32.vlgmr.msrb.gmra.mxu0 %vm965_vm11, %v948_v42 }
 0x30a   : > { %v1013_v49 = vpop.f32.mrf.mxu1 }
 0x30b   : > { %v1014_v21 = vadd.f32 %v1013_v49, %v963_v47 }
 0x30d   : > { %v1017_v50 = vmax.f32 %v1014_v21, 0.0 }
 0x30f   : > { %v1020_v41 = vrot.slane %v1017_v50, 4 }
 0x312   : > { %v993_v58 = vpop.f32.mrf.mxu0 }
 0x313   : > { %v994_v9 = vadd.f32 %v993_v58, %v963_v47 }
 0x315   : > { %v1016_v52 = vmax.f32 %v994_v9, 0.0 }
 0x317   : > { %v1021_v46 = vsel %vm969_vm10, %v1016_v52, %v1020_v41 }
 0x318   : > { %1023 = vst [vmem:[%s322_s17] sm:$0xff] %v1021_v46 }
 0x319 PF: > { %s18_s27 = sadd.s32 1, %s1142_s27  }
 0x31a   : > { %p15_p4 = scmp.ge.s32.totalorder %s18_s27, 4  }
 0x31c   :  { %17 = sbr.rel (!%p15_p4) target bundleno = 1 (0x1), region = 85 }

</bundles_post_ra>
